<compile_context>
chip_gen: v7x
topology: tpu7x:2x2x1
jax: 0.10.0
libtpu: 0.0.40
codegen_flags: <defaults>
</compile_context>

<pallas_src>
import functools

import jax
import jax.numpy as jnp
import numpy as np
from jax.experimental import pallas as pl
from jax.experimental.pallas import tpu as pltpu


# --------------------------------------------------------------------------- #
# Kernel helpers
# --------------------------------------------------------------------------- #
def _masked_rows(v, start_row, seq_len):
    """Zero rows whose global sequence index falls outside [0, seq_len).

    This realises Conv1d zero padding at both sequence edges and masks the
    stale tail of blocks that overhang the array — entirely in VMEM, so no
    padded copy of x is ever materialised in HBM.
    """
    g = start_row + jax.lax.broadcasted_iota(jnp.int32, (v.shape[0], 1), 0)
    return jnp.where(jnp.logical_and(g >= 0, g < seq_len), v, 0.0)


def _build_window(x_ref, top_ref, bot_ref, xwin_ref, *, seq_len, hb):
    """Assemble the halo'd f32 window [top | centre | bottom] in VMEM scratch.

    All three stores land at sublane-aligned offsets (0, hb, hb + tl).
    Returns the masked centre rows (reused for the final x * attention mul).
    """
    i = pl.program_id(1)
    tl = x_ref.shape[1]
    base = i * tl

    ctr = _masked_rows(x_ref[0].astype(jnp.float32), base, seq_len)
    xwin_ref[hb:hb + tl, :] = ctr
    xwin_ref[0:hb, :] = _masked_rows(
        top_ref[0].astype(jnp.float32), base - hb, seq_len)
    xwin_ref[hb + tl:2 * hb + tl, :] = _masked_rows(
        bot_ref[0].astype(jnp.float32), base + tl, seq_len)
    return ctr


def _msa_kernel_narrow(x_ref, top_ref, bot_ref, w_ref, b_ref, s_ref,
                       out_ref, xwin_ref, *, seq_len, hb, p_max, k_max):
    """Path for C < 128 (test case): tap-stacked f32 dots, matmul-mean."""
    tl = out_ref.shape[1]
    ctr = _build_window(x_ref, top_ref, bot_ref, xwin_ref, seq_len=seq_len, hb=hb)
    w0 = hb - p_max

    # Multi-scale conv: one (tl, C) @ (C, n_convs*C) f32 MXU dot per tap,
    # accumulation seeded by the first tap (no zeros init, no bf16 casts).
    y = jnp.dot(xwin_ref[w0:w0 + tl, :], w_ref[0],
                preferred_element_type=jnp.float32)
    for s in range(1, k_max):
        y = y + jnp.dot(xwin_ref[w0 + s:w0 + s + tl, :], w_ref[s],
                        preferred_element_type=jnp.float32)

    y = jnp.maximum(y + b_ref[...], 0.0)          # bias + ReLU, all convs at once

    # Mean over the n_convs column blocks as one tiny matmul with a stacked
    # (I / n_convs) matrix: keeps the reduction off lane-offset slices (XLU)
    # for C that is not a multiple of 128.
    attn = jax.nn.sigmoid(jnp.dot(y, s_ref[...],
                                  preferred_element_type=jnp.float32))
    out_ref[0] = (ctr * attn).astype(out_ref.dtype)


def _msa_kernel_wide(x_ref, top_ref, bot_ref, w_ref, b_ref,
                     out_ref, xwin_ref, *, seq_len, hb, p_max, k_max, n_convs):
    """Path for C % 128 == 0: lane-aligned im2col, one matmul per conv."""
    tl = out_ref.shape[1]
    ctr = _build_window(x_ref, top_ref, bot_ref, xwin_ref, seq_len=seq_len, hb=hb)
    w0 = hb - p_max

    # im2col stage: (tl, k_max*C), lane-aligned concat since C % 128 == 0, so
    # each conv is a single K = k_max*C matmul instead of k_max tiny ones.
    if k_max > 1:
        xcol = jnp.concatenate(
            [xwin_ref[w0 + s:w0 + s + tl, :] for s in range(k_max)], axis=1)
    else:
        xcol = xwin_ref[w0:w0 + tl, :]

    acc = None
    for j in range(n_convs):
        y = jnp.dot(xcol, w_ref[j], preferred_element_type=jnp.float32)
        y = jnp.maximum(y + b_ref[j], 0.0)
        acc = y if acc is None else acc + y       # mean over convs: plain VPU adds
    attn = jax.nn.sigmoid(acc * (1.0 / n_convs))
    out_ref[0] = (ctr * attn).astype(out_ref.dtype)


# --------------------------------------------------------------------------- #
# Wrapper
# --------------------------------------------------------------------------- #
def multi_scale_attention(x, weights, biases, *, tile_l=1024):
    """x: (B, L, C).  weights[i]: (C, C, k_i) (PyTorch Conv1d).  biases[i]: (C,)."""
    B, L, C = x.shape
    n_convs = len(weights)
    k_sizes = [int(w.shape[-1]) for w in weights]
    for k in k_sizes:
        if k % 2 != 1:
            raise ValueError("even kernel_size with padding=k//2 changes the "
                             "sequence length; the module implies odd k.")
    k_max = max(k_sizes)
    p_max = k_max // 2

    # Halo strip (rows): multiple of 8, >= p_max, capped by the full dim.
    hb = min(max(8, 8 * pl.cdiv(max(p_max, 1), 8)), L)

    # Sequence tile (sublane dim): whole sequence when it fits one tile,
    # otherwise the largest multiple of hb <= tile_l (keeps halo block-index
    # arithmetic exact and amortises per-grid-step overhead).
    if L <= hb:
        tl = L
    else:
        tl = max(hb, (min(L, tile_l) // hb) * hb)
    nl = pl.cdiv(L, tl)
    rpb = tl // hb              # hb-blocks per tile
    nhb = pl.cdiv(L, hb)        # number of hb-row blocks along the sequence

    wide = (C % 128 == 0)

    # ----- stacked f32 parameters (full precision; MXU under-utilised anyway).
    if not wide:
        w_param = jnp.zeros((k_max, C, n_convs * C), jnp.float32)
        for j, (w, k) in enumerate(zip(weights, k_sizes)):
            off = p_max - k // 2
            wt = jnp.transpose(w.astype(jnp.float32), (2, 1, 0))   # (k, Cin, Cout)
            w_param = w_param.at[off:off + k, :, j * C:(j + 1) * C].set(wt)
        b_param = jnp.concatenate(
            [b.astype(jnp.float32).reshape(1, C) for b in biases], axis=1)
        s_param = jnp.concatenate(
            [jnp.eye(C, dtype=jnp.float32) / n_convs] * n_convs, axis=0)
        params = (w_param, b_param, s_param)
        param_specs = [
            pl.BlockSpec((k_max, C, n_convs * C), lambda b, i: (0, 0, 0)),
            pl.BlockSpec((1, n_convs * C), lambda b, i: (0, 0)),
            pl.BlockSpec((n_convs * C, C), lambda b, i: (0, 0)),
        ]
        kernel = functools.partial(_msa_kernel_narrow, seq_len=L, hb=hb,
                                   p_max=p_max, k_max=k_max)
    else:
        blocks = []
        for w, k in zip(weights, k_sizes):
            off = p_max - k // 2
            wt = jnp.transpose(w.astype(jnp.float32), (2, 1, 0))
            full = jnp.zeros((k_max, C, C), jnp.float32).at[off:off + k].set(wt)
            blocks.append(full.reshape(k_max * C, C))
        w_param = jnp.stack(blocks, axis=0)                        # (n, k*C, C)
        b_param = jnp.stack(
            [b.astype(jnp.float32).reshape(1, C) for b in biases], axis=0)
        params = (w_param, b_param)
        param_specs = [
            pl.BlockSpec((n_convs, k_max * C, C), lambda b, i: (0, 0, 0)),
            pl.BlockSpec((n_convs, 1, C), lambda b, i: (0, 0, 0)),
        ]
        kernel = functools.partial(_msa_kernel_wide, seq_len=L, hb=hb,
                                   p_max=p_max, k_max=k_max, n_convs=n_convs)

    # ----- VMEM budget: account for the pipeline's double buffers (including
    # the constant-index weight blocks, which are not re-fetched but are
    # still allocated twice) and the in-kernel f32 temporaries; cap at 40 MiB
    # so there is headroom on v7x's 64 MiB VMEM.
    xsz = x.dtype.itemsize
    param_bytes = sum(int(p.size) * 4 for p in params)
    est = (2 * tl * C * xsz                 # centre input block (double-buffered)
           + 2 * 2 * hb * C * xsz           # two halo strips (double-buffered)
           + 2 * tl * C * xsz               # output block (double-buffered)
           + 2 * param_bytes                # stacked weights / bias / mean matrix
           + (2 * hb + tl) * C * 4          # f32 window scratch
           + 3 * tl * max(n_convs, k_max) * C * 4)   # f32 temporaries
    vmem_limit = int(min(max(4 * est, 32 * 1024 * 1024), 40 * 1024 * 1024))

    grid_spec = pltpu.PrefetchScalarGridSpec(
        num_scalar_prefetch=0,
        grid=(B, nl),
        in_specs=[
            # centre tile: the bulk of the traffic, auto double-buffered.
            pl.BlockSpec((1, tl, C), lambda b, i: (b, i, 0)),
            # top / bottom halo strips (hb = 8 rows: ~1-2% extra read traffic);
            # clamped block indices at the edges, values masked in-kernel.
            pl.BlockSpec((1, hb, C),
                         lambda b, i: (b, jnp.maximum(i * rpb - 1, 0), 0)),
            pl.BlockSpec((1, hb, C),
                         lambda b, i: (b, jnp.minimum((i + 1) * rpb, nhb - 1), 0)),
            *param_specs,
        ],
        out_specs=pl.BlockSpec((1, tl, C), lambda b, i: (b, i, 0)),
        scratch_shapes=[pltpu.VMEM((2 * hb + tl, C), jnp.float32)],
    )

    out = pl.pallas_call(
        kernel,
        out_shape=jax.ShapeDtypeStruct((B, L, C), x.dtype),   # caller's dtype, no post-cast
        grid_spec=grid_spec,
        compiler_params=pltpu.CompilerParams(
            dimension_semantics=("parallel", "parallel"),
            vmem_limit_bytes=vmem_limit),
    )(x, x, x, *params)
    return out


# --------------------------------------------------------------------------- #
# Pure-JAX reference (matches the PyTorch forward)
# --------------------------------------------------------------------------- #
def _reference(x_blc, weights, biases):
    x = jnp.transpose(x_blc, (0, 2, 1)).astype(jnp.float32)       # (B, C, L)
    outs = []
    for w, b in zip(weights, biases):
        k = int(w.shape[-1])
        p = k // 2
        y = jax.lax.conv_general_dilated(
            x, w.astype(jnp.float32),
            window_strides=(1,), padding=[(p, p)],
            dimension_numbers=("NCH", "OIH", "NCH"),
            precision=jax.lax.Precision.HIGHEST)
        outs.append(jax.nn.relu(y + b.astype(jnp.float32)[None, :, None]))
    attn = jax.nn.sigmoid(jnp.mean(jnp.stack(outs, axis=0), axis=0))
    return jnp.transpose(x * attn, (0, 2, 1)).astype(x_blc.dtype)


if __name__ == "__main__":
    # Small shapes consistent with the module: x is (B, L, C), C = in_channels.
    B, L, C = 2, 16, 8
    k_sizes = (3, 5, 7)

    key = jax.random.PRNGKey(0)
    key, xk = jax.random.split(key)
    x = jax.random.normal(xk, (B, L, C), dtype=jnp.float32)

    # Deterministic Conv1d-style init: U(-bound, bound), bound = 1/sqrt(C*k).
    weights, biases = [], []
    for ks in k_sizes:
        key, wk, bk = jax.random.split(key, 3)
        bound = 1.0 / np.sqrt(C * ks)
        weights.append(jax.random.uniform(
            wk, (C, C, ks), minval=-bound, maxval=bound, dtype=jnp.float32))
        biases.append(jax.random.uniform(
            bk, (C,), minval=-bound, maxval=bound, dtype=jnp.float32))

    out = multi_scale_attention(x, weights, biases)
    out = jax.block_until_ready(out)

    ref = _reference(x, weights, biases)
    # f32 compute end-to-end; tolerance covers MXU f32 multi-pass accumulation
    # and EUP transcendental rounding.
    np.testing.assert_allclose(np.asarray(out), np.asarray(ref),
                               rtol=2e-3, atol=2e-3)
    assert out.shape == (B, L, C) and out.dtype == x.dtype

    print("KERNEL_OK")
</pallas_src>

<mosaic_0001>
module attributes {stable_mosaic.version = 11 : i64} {
  func.func @_msa_kernel_narrow(%arg0: i32, %arg1: i32, %arg2: memref<1x16x8xf32, #tpu.memory_space<vmem>>, %arg3: memref<1x8x8xf32, #tpu.memory_space<vmem>>, %arg4: memref<1x8x8xf32, #tpu.memory_space<vmem>>, %arg5: memref<7x8x24xf32, #tpu.memory_space<vmem>>, %arg6: memref<1x24xf32, #tpu.memory_space<vmem>>, %arg7: memref<24x8xf32, #tpu.memory_space<vmem>>, %arg8: memref<1x16x8xf32, #tpu.memory_space<vmem>>, %arg9: memref<32x8xf32, #tpu.memory_space<vmem>>) attributes {dimension_semantics = [#tpu.dimension_semantics<parallel>, #tpu.dimension_semantics<parallel>], iteration_bounds = array<i64: 2, 1>, scalar_prefetch = 0 : i64, scratch_operands = 1 : i64, tpu.core_type = #tpu.core_type<tc>, window_params = [{transform_indices = @transform_0, window_bounds = array<i64: 1, 16, 8>}, {transform_indices = @transform_1, window_bounds = array<i64: 1, 8, 8>}, {transform_indices = @transform_2, window_bounds = array<i64: 1, 8, 8>}, {pipeline_mode = #tpu.pipeline_mode<synchronous>, transform_indices = @transform_3, window_bounds = array<i64: 7, 8, 24>}, {pipeline_mode = #tpu.pipeline_mode<synchronous>, transform_indices = @transform_4, window_bounds = array<i64: 1, 24>}, {pipeline_mode = #tpu.pipeline_mode<synchronous>, transform_indices = @transform_5, window_bounds = array<i64: 24, 8>}, {transform_indices = @transform_6, window_bounds = array<i64: 1, 16, 8>}]} {
    %c16_i32 = arith.constant 16 : i32
    %0 = arith.muli %arg1, %c16_i32 : i32
    %c0 = arith.constant 0 : index
    %c0_0 = arith.constant 0 : index
    %c0_1 = arith.constant 0 : index
    %1 = vector.load %arg2[%c0, %c0_0, %c0_1] : memref<1x16x8xf32, #tpu.memory_space<vmem>>, vector<1x16x8xf32>
    %2 = vector.shape_cast %1 : vector<1x16x8xf32> to vector<16x8xf32>
    %3 = tpu.iota {dimensions = array<i32: 0>} : vector<16x1xi32>
    %4 = vector.broadcast %0 : i32 to vector<16x1xi32>
    %5 = arith.addi %4, %3 : vector<16x1xi32>
    %c0_i32 = arith.constant 0 : i32
    %6 = vector.broadcast %c0_i32 : i32 to vector<16x1xi32>
    %7 = arith.cmpi sge, %5, %6 : vector<16x1xi32>
    %c16_i32_2 = arith.constant 16 : i32
    %8 = vector.broadcast %c16_i32_2 : i32 to vector<16x1xi32>
    %9 = arith.cmpi slt, %5, %8 : vector<16x1xi32>
    %10 = arith.andi %7, %9 : vector<16x1xi1>
    %cst = arith.constant 0.000000e+00 : f32
    %11 = vector.shape_cast %10 : vector<16x1xi1> to vector<16x1xi1>
    %12 = vector.broadcast %11 : vector<16x1xi1> to vector<16x8xi1>
    %13 = vector.broadcast %cst : f32 to vector<16x8xf32>
    %14 = arith.select %12, %2, %13 : vector<16x8xi1>, vector<16x8xf32>
    %c8 = arith.constant 8 : index
    %c0_3 = arith.constant 0 : index
    %15 = vector.load %arg9[%c8, %c0_3] : memref<32x8xf32, #tpu.memory_space<vmem>>, vector<16x8xf32>
    tpu.vector_store %arg9[%c8, %c0_3], %14 {strides = array<i32>} : memref<32x8xf32, #tpu.memory_space<vmem>>, vector<16x8xf32>,
    %c0_4 = arith.constant 0 : index
    %c0_5 = arith.constant 0 : index
    %c0_6 = arith.constant 0 : index
    %16 = vector.load %arg3[%c0_4, %c0_5, %c0_6] : memref<1x8x8xf32, #tpu.memory_space<vmem>>, vector<1x8x8xf32>
    %17 = vector.shape_cast %16 : vector<1x8x8xf32> to vector<8x8xf32>
    %c8_i32 = arith.constant 8 : i32
    %18 = arith.subi %0, %c8_i32 : i32
    %19 = tpu.iota {dimensions = array<i32: 0>} : vector<8x1xi32>
    %20 = vector.broadcast %18 : i32 to vector<8x1xi32>
    %21 = arith.addi %20, %19 : vector<8x1xi32>
    %c0_i32_7 = arith.constant 0 : i32
    %22 = vector.broadcast %c0_i32_7 : i32 to vector<8x1xi32>
    %23 = arith.cmpi sge, %21, %22 : vector<8x1xi32>
    %c16_i32_8 = arith.constant 16 : i32
    %24 = vector.broadcast %c16_i32_8 : i32 to vector<8x1xi32>
    %25 = arith.cmpi slt, %21, %24 : vector<8x1xi32>
    %26 = arith.andi %23, %25 : vector<8x1xi1>
    %cst_9 = arith.constant 0.000000e+00 : f32
    %27 = vector.shape_cast %26 : vector<8x1xi1> to vector<8x1xi1>
    %28 = vector.broadcast %27 : vector<8x1xi1> to vector<8x8xi1>
    %29 = vector.broadcast %cst_9 : f32 to vector<8x8xf32>
    %30 = arith.select %28, %17, %29 : vector<8x8xi1>, vector<8x8xf32>
    %c0_10 = arith.constant 0 : index
    %c0_11 = arith.constant 0 : index
    %31 = vector.load %arg9[%c0_10, %c0_11] : memref<32x8xf32, #tpu.memory_space<vmem>>, vector<8x8xf32>
    tpu.vector_store %arg9[%c0_10, %c0_11], %30 {strides = array<i32>} : memref<32x8xf32, #tpu.memory_space<vmem>>, vector<8x8xf32>,
    %c0_12 = arith.constant 0 : index
    %c0_13 = arith.constant 0 : index
    %c0_14 = arith.constant 0 : index
    %32 = vector.load %arg4[%c0_12, %c0_13, %c0_14] : memref<1x8x8xf32, #tpu.memory_space<vmem>>, vector<1x8x8xf32>
    %33 = vector.shape_cast %32 : vector<1x8x8xf32> to vector<8x8xf32>
    %c16_i32_15 = arith.constant 16 : i32
    %34 = arith.addi %0, %c16_i32_15 : i32
    %35 = tpu.iota {dimensions = array<i32: 0>} : vector<8x1xi32>
    %36 = vector.broadcast %34 : i32 to vector<8x1xi32>
    %37 = arith.addi %36, %35 : vector<8x1xi32>
    %c0_i32_16 = arith.constant 0 : i32
    %38 = vector.broadcast %c0_i32_16 : i32 to vector<8x1xi32>
    %39 = arith.cmpi sge, %37, %38 : vector<8x1xi32>
    %c16_i32_17 = arith.constant 16 : i32
    %40 = vector.broadcast %c16_i32_17 : i32 to vector<8x1xi32>
    %41 = arith.cmpi slt, %37, %40 : vector<8x1xi32>
    %42 = arith.andi %39, %41 : vector<8x1xi1>
    %cst_18 = arith.constant 0.000000e+00 : f32
    %43 = vector.shape_cast %42 : vector<8x1xi1> to vector<8x1xi1>
    %44 = vector.broadcast %43 : vector<8x1xi1> to vector<8x8xi1>
    %45 = vector.broadcast %cst_18 : f32 to vector<8x8xf32>
    %46 = arith.select %44, %33, %45 : vector<8x8xi1>, vector<8x8xf32>
    %c24 = arith.constant 24 : index
    %c0_19 = arith.constant 0 : index
    %47 = vector.load %arg9[%c24, %c0_19] : memref<32x8xf32, #tpu.memory_space<vmem>>, vector<8x8xf32>
    tpu.vector_store %arg9[%c24, %c0_19], %46 {strides = array<i32>} : memref<32x8xf32, #tpu.memory_space<vmem>>, vector<8x8xf32>,
    %c5 = arith.constant 5 : index
    %c0_20 = arith.constant 0 : index
    %48 = vector.load %arg9[%c5, %c0_20] : memref<32x8xf32, #tpu.memory_space<vmem>>, vector<16x8xf32>
    %c0_21 = arith.constant 0 : index
    %c0_22 = arith.constant 0 : index
    %c0_23 = arith.constant 0 : index
    %49 = vector.load %arg5[%c0_21, %c0_22, %c0_23] : memref<7x8x24xf32, #tpu.memory_space<vmem>>, vector<1x8x24xf32>
    %50 = vector.shape_cast %49 : vector<1x8x24xf32> to vector<8x24xf32>
    %cst_24 = arith.constant dense<0.000000e+00> : vector<16x24xf32>
    %51 = tpu.matmul %48, %50, %cst_24 {dimension_numbers = #tpu.dot_dimension_numbers<[1], [0], [0], [1], [0, 0, 1, 1], [], []>} : vector<16x8xf32>, vector<8x24xf32>, vector<16x24xf32> -> vector<16x24xf32>
    %c6 = arith.constant 6 : index
    %c0_25 = arith.constant 0 : index
    %52 = vector.load %arg9[%c6, %c0_25] : memref<32x8xf32, #tpu.memory_space<vmem>>, vector<16x8xf32>
    %c1 = arith.constant 1 : index
    %c0_26 = arith.constant 0 : index
    %c0_27 = arith.constant 0 : index
    %53 = vector.load %arg5[%c1, %c0_26, %c0_27] : memref<7x8x24xf32, #tpu.memory_space<vmem>>, vector<1x8x24xf32>
    %54 = vector.shape_cast %53 : vector<1x8x24xf32> to vector<8x24xf32>
    %cst_28 = arith.constant dense<0.000000e+00> : vector<16x24xf32>
    %55 = tpu.matmul %52, %54, %cst_28 {dimension_numbers = #tpu.dot_dimension_numbers<[1], [0], [0], [1], [0, 0, 1, 1], [], []>} : vector<16x8xf32>, vector<8x24xf32>, vector<16x24xf32> -> vector<16x24xf32>
    %56 = arith.addf %51, %55 : vector<16x24xf32>
    %c7 = arith.constant 7 : index
    %c0_29 = arith.constant 0 : index
    %57 = vector.load %arg9[%c7, %c0_29] : memref<32x8xf32, #tpu.memory_space<vmem>>, vector<16x8xf32>
    %c2 = arith.constant 2 : index
    %c0_30 = arith.constant 0 : index
    %c0_31 = arith.constant 0 : index
    %58 = vector.load %arg5[%c2, %c0_30, %c0_31] : memref<7x8x24xf32, #tpu.memory_space<vmem>>, vector<1x8x24xf32>
    %59 = vector.shape_cast %58 : vector<1x8x24xf32> to vector<8x24xf32>
    %cst_32 = arith.constant dense<0.000000e+00> : vector<16x24xf32>
    %60 = tpu.matmul %57, %59, %cst_32 {dimension_numbers = #tpu.dot_dimension_numbers<[1], [0], [0], [1], [0, 0, 1, 1], [], []>} : vector<16x8xf32>, vector<8x24xf32>, vector<16x24xf32> -> vector<16x24xf32>
    %61 = arith.addf %56, %60 : vector<16x24xf32>
    %c8_33 = arith.constant 8 : index
    %c0_34 = arith.constant 0 : index
    %62 = vector.load %arg9[%c8_33, %c0_34] : memref<32x8xf32, #tpu.memory_space<vmem>>, vector<16x8xf32>
    %c3 = arith.constant 3 : index
    %c0_35 = arith.constant 0 : index
    %c0_36 = arith.constant 0 : index
    %63 = vector.load %arg5[%c3, %c0_35, %c0_36] : memref<7x8x24xf32, #tpu.memory_space<vmem>>, vector<1x8x24xf32>
    %64 = vector.shape_cast %63 : vector<1x8x24xf32> to vector<8x24xf32>
    %cst_37 = arith.constant dense<0.000000e+00> : vector<16x24xf32>
    %65 = tpu.matmul %62, %64, %cst_37 {dimension_numbers = #tpu.dot_dimension_numbers<[1], [0], [0], [1], [0, 0, 1, 1], [], []>} : vector<16x8xf32>, vector<8x24xf32>, vector<16x24xf32> -> vector<16x24xf32>
    %66 = arith.addf %61, %65 : vector<16x24xf32>
    %c9 = arith.constant 9 : index
    %c0_38 = arith.constant 0 : index
    %67 = vector.load %arg9[%c9, %c0_38] : memref<32x8xf32, #tpu.memory_space<vmem>>, vector<16x8xf32>
    %c4 = arith.constant 4 : index
    %c0_39 = arith.constant 0 : index
    %c0_40 = arith.constant 0 : index
    %68 = vector.load %arg5[%c4, %c0_39, %c0_40] : memref<7x8x24xf32, #tpu.memory_space<vmem>>, vector<1x8x24xf32>
    %69 = vector.shape_cast %68 : vector<1x8x24xf32> to vector<8x24xf32>
    %cst_41 = arith.constant dense<0.000000e+00> : vector<16x24xf32>
    %70 = tpu.matmul %67, %69, %cst_41 {dimension_numbers = #tpu.dot_dimension_numbers<[1], [0], [0], [1], [0, 0, 1, 1], [], []>} : vector<16x8xf32>, vector<8x24xf32>, vector<16x24xf32> -> vector<16x24xf32>
    %71 = arith.addf %66, %70 : vector<16x24xf32>
    %c10 = arith.constant 10 : index
    %c0_42 = arith.constant 0 : index
    %72 = vector.load %arg9[%c10, %c0_42] : memref<32x8xf32, #tpu.memory_space<vmem>>, vector<16x8xf32>
    %c5_43 = arith.constant 5 : index
    %c0_44 = arith.constant 0 : index
    %c0_45 = arith.constant 0 : index
    %73 = vector.load %arg5[%c5_43, %c0_44, %c0_45] : memref<7x8x24xf32, #tpu.memory_space<vmem>>, vector<1x8x24xf32>
    %74 = vector.shape_cast %73 : vector<1x8x24xf32> to vector<8x24xf32>
    %cst_46 = arith.constant dense<0.000000e+00> : vector<16x24xf32>
    %75 = tpu.matmul %72, %74, %cst_46 {dimension_numbers = #tpu.dot_dimension_numbers<[1], [0], [0], [1], [0, 0, 1, 1], [], []>} : vector<16x8xf32>, vector<8x24xf32>, vector<16x24xf32> -> vector<16x24xf32>
    %76 = arith.addf %71, %75 : vector<16x24xf32>
    %c11 = arith.constant 11 : index
    %c0_47 = arith.constant 0 : index
    %77 = vector.load %arg9[%c11, %c0_47] : memref<32x8xf32, #tpu.memory_space<vmem>>, vector<16x8xf32>
    %c6_48 = arith.constant 6 : index
    %c0_49 = arith.constant 0 : index
    %c0_50 = arith.constant 0 : index
    %78 = vector.load %arg5[%c6_48, %c0_49, %c0_50] : memref<7x8x24xf32, #tpu.memory_space<vmem>>, vector<1x8x24xf32>
    %79 = vector.shape_cast %78 : vector<1x8x24xf32> to vector<8x24xf32>
    %cst_51 = arith.constant dense<0.000000e+00> : vector<16x24xf32>
    %80 = tpu.matmul %77, %79, %cst_51 {dimension_numbers = #tpu.dot_dimension_numbers<[1], [0], [0], [1], [0, 0, 1, 1], [], []>} : vector<16x8xf32>, vector<8x24xf32>, vector<16x24xf32> -> vector<16x24xf32>
    %81 = arith.addf %76, %80 : vector<16x24xf32>
    %c0_52 = arith.constant 0 : index
    %c0_53 = arith.constant 0 : index
    %82 = vector.load %arg6[%c0_52, %c0_53] : memref<1x24xf32, #tpu.memory_space<vmem>>, vector<1x24xf32>
    %83 = vector.broadcast %82 : vector<1x24xf32> to vector<16x24xf32>
    %84 = arith.addf %81, %83 : vector<16x24xf32>
    %cst_54 = arith.constant 0.000000e+00 : f32
    %85 = vector.broadcast %cst_54 : f32 to vector<16x24xf32>
    %86 = arith.maximumf %84, %85 : vector<16x24xf32>
    %c0_55 = arith.constant 0 : index
    %c0_56 = arith.constant 0 : index
    %87 = vector.load %arg7[%c0_55, %c0_56] : memref<24x8xf32, #tpu.memory_space<vmem>>, vector<24x8xf32>
    %cst_57 = arith.constant dense<0.000000e+00> : vector<16x8xf32>
    %88 = tpu.matmul %86, %87, %cst_57 {dimension_numbers = #tpu.dot_dimension_numbers<[1], [0], [0], [1], [0, 0, 1, 1], [], []>} : vector<16x24xf32>, vector<24x8xf32>, vector<16x8xf32> -> vector<16x8xf32>
    %89 = arith.negf %88 : vector<16x8xf32>
    %90 = math.exp %89 : vector<16x8xf32>
    %cst_58 = arith.constant 1.000000e+00 : f32
    %91 = vector.broadcast %cst_58 : f32 to vector<16x8xf32>
    %92 = arith.addf %91, %90 : vector<16x8xf32>
    %93 = arith.divf %91, %92 : vector<16x8xf32>
    %94 = arith.mulf %14, %93 : vector<16x8xf32>
    %c0_59 = arith.constant 0 : index
    %c0_60 = arith.constant 0 : index
    %c0_61 = arith.constant 0 : index
    %95 = vector.load %arg8[%c0_59, %c0_60, %c0_61] : memref<1x16x8xf32, #tpu.memory_space<vmem>>, vector<1x16x8xf32>
    %96 = vector.shape_cast %95 : vector<1x16x8xf32> to vector<16x8xf32>
    %97 = vector.shape_cast %94 : vector<16x8xf32> to vector<1x16x8xf32>
    tpu.vector_store %arg8[%c0_59, %c0_60, %c0_61], %97 {strides = array<i32>} : memref<1x16x8xf32, #tpu.memory_space<vmem>>, vector<1x16x8xf32>,
    return
  }
  func.func @transform_0(%arg0: i32, %arg1: i32) -> (i32, i32, i32) {
    %c0_i32 = arith.constant 0 : i32
    %c0_i32_0 = arith.constant 0 : i32
    return %arg0, %arg1, %c0_i32 : i32, i32, i32
  }
  func.func @transform_1(%arg0: i32, %arg1: i32) -> (i32, i32, i32) {
    %c2_i32 = arith.constant 2 : i32
    %0 = arith.muli %arg1, %c2_i32 : i32
    %c1_i32 = arith.constant 1 : i32
    %1 = arith.subi %0, %c1_i32 : i32
    %c0_i32 = arith.constant 0 : i32
    %2 = arith.maxsi %1, %c0_i32 : i32
    %c0_i32_0 = arith.constant 0 : i32
    %c0_i32_1 = arith.constant 0 : i32
    return %arg0, %2, %c0_i32_0 : i32, i32, i32
  }
  func.func @transform_2(%arg0: i32, %arg1: i32) -> (i32, i32, i32) {
    %c1_i32 = arith.constant 1 : i32
    %0 = arith.addi %arg1, %c1_i32 : i32
    %c2_i32 = arith.constant 2 : i32
    %1 = arith.muli %0, %c2_i32 : i32
    %c1_i32_0 = arith.constant 1 : i32
    %2 = arith.minsi %1, %c1_i32_0 : i32
    %c0_i32 = arith.constant 0 : i32
    %c0_i32_1 = arith.constant 0 : i32
    return %arg0, %2, %c0_i32 : i32, i32, i32
  }
  func.func @transform_3(%arg0: i32, %arg1: i32) -> (i32, i32, i32) {
    %c0_i32 = arith.constant 0 : i32
    %c0_i32_0 = arith.constant 0 : i32
    %c0_i32_1 = arith.constant 0 : i32
    %c0_i32_2 = arith.constant 0 : i32
    return %c0_i32, %c0_i32_0, %c0_i32_1 : i32, i32, i32
  }
  func.func @transform_4(%arg0: i32, %arg1: i32) -> (i32, i32) {
    %c0_i32 = arith.constant 0 : i32
    %c0_i32_0 = arith.constant 0 : i32
    %c0_i32_1 = arith.constant 0 : i32
    return %c0_i32, %c0_i32_0 : i32, i32
  }
  func.func @transform_5(%arg0: i32, %arg1: i32) -> (i32, i32) {
    %c0_i32 = arith.constant 0 : i32
    %c0_i32_0 = arith.constant 0 : i32
    %c0_i32_1 = arith.constant 0 : i32
    return %c0_i32, %c0_i32_0 : i32, i32
  }
  func.func @transform_6(%arg0: i32, %arg1: i32) -> (i32, i32, i32) {
    %c0_i32 = arith.constant 0 : i32
    %c0_i32_0 = arith.constant 0 : i32
    return %arg0, %arg1, %c0_i32 : i32, i32, i32
  }
}

</mosaic_0001>

<bundles_post_ra>
// kernel: tpu_custom_call.1
= control target key start
LH: loop header
LB: loop body
LE: loop exit
PB: predicated region body
PF: predicated region fallthrough
CT: control target
= control target key end

     0   :  { %s1518_s21 = smov 0   ;;  %s1520_s22 = smov 0   ;;  %s1619_s0 = inlined_call_operand.vmem [shape: f32[2,16,8], index: 0, kind: input, shape index: {}]   ;;  %s1620_s1 = inlined_call_operand.vmem [shape: f32[2,16,8], index: 1, kind: input, shape index: {}]   ;;  %s1621_s2 = inlined_call_operand.vmem [shape: f32[2,16,8], index: 2, kind: input, shape index: {}]   ;;  %s1622_s3 = inlined_call_operand.vmem [shape: f32[7,8,24], index: 3, kind: input, shape index: {}]   ;;  %s1623_s4 = inlined_call_operand.vmem [shape: f32[1,24], index: 4, kind: input, shape index: {}]   ;;  %s1624_s5 = inlined_call_operand.vmem [shape: f32[24,8], index: 5, kind: input, shape index: {}]   ;;  %s1625_s6 = inlined_call_operand.vmem [shape: f32[2,16,8], index: 6, kind: output, shape index: {}]  }
   0x1   :  { %s1522_s1 = smov 0  }
   0x2 LB: > { %s28_s2 = sadd.s32 1, %s1476_s22  ;;  %p1298_p0 = scmp.ge.s32.totalorder %s1480_s1, 1  ;;  %s1480_s1 = sphi %s1522_s1, %s16_s1   ;;  %s1476_s22 = sphi %s1520_s22, %s1627_s22   ;;  %s1472_s21 = sphi %s1518_s21, %s1626_s21  }
   0x3   : > { %p30_p1 = scmp.ge.s32.totalorder %s28_s2, 2  ;;  %p295_p2 = scmp.lt.s32.totalorder %s1480_s1, 3 }
   0x5   : > { %s1629_s2 = smov (%p30_p1, %s28_s2), 0  ;;  %p296_p3 = pnand %p1298_p0, %p295_p2 }
   0x6   : > { %v1315_v0 = vld [vmem:[%s1622_s3 + $0x18] sm:$0xff] (!%p296_p3)  ;;  %v1307_v1 = vld [vmem:[%s1622_s3 + $0x8] sm:$0xff] (!%p296_p3)  ;;  %p358_p4 = scmp.lt.s32.totalorder (!%p296_p3), %s1472_s21, 1  ;;  %vm430_vm0 = vcmask (!%p296_p3), 64512   ;;  %v1318_v2 = vld [vmem:[%s1622_s3 + $0x20] sm:$0xff] (!%p296_p3)  ;;  %v1482_v3 = vmov (!%p296_p3), 0.0  }
   0x7   : > { %299 = sbr.rel (%p296_p3) target bundleno = 514 (0x202), region = 44  ;;  %1380 = vmatprep.subr.mxu0 (!%p296_p3), %v1315_v0  ;;  %1365 = vmatprep.subr.mxu1 (!%p296_p3), %v1307_v1  ;;  %443 = vst.msk [vmem:[#allocation2] sm:$0xff] (!%p296_p3), %vm430_vm0, %v1482_v3  ;;  %454 = vst.msk [vmem:[#allocation2 + $0x18] sm:$0xff] (!%p296_p3), %vm430_vm0, %v1482_v3  ;;  %v457_v4 = vld [vmem:[%s1622_s3] sm:$0xff] (!%p296_p3)  ;;  %v1321_v13 = vld [vmem:[%s1622_s3 + $0x28] sm:$0xff] (!%p296_p3)  ;;  %vm1073_vm1 = vcmask (!%p296_p3), 195584  }
   0x8   : > { %1381 = vmatpush3.msra.mxu0 (!%p296_p3), %v1315_v0  ;;  %1366 = vmatpush3.msra.mxu1 (!%p296_p3), %v1307_v1  ;;  %v1312_v14 = vld [vmem:[%s1622_s3 + $0x10] sm:$0xff] (!%p296_p3)  ;;  %v1070_v24 = vld [vmem:[%s1624_s5] sm:$0xff] (!%p296_p3)  ;;  %v1071_v25 = vld [vmem:[%s1624_s5 + $0x8] sm:$0xff] (!%p296_p3) }
   0x9   : > { %1385 = vmatprep.subr.mxu0 (!%p296_p3), %v1318_v2  ;;  %1370 = vmatprep.subr.mxu1 (!%p296_p3), %v457_v4  ;;  %v1324_v19 = vld [vmem:[%s1622_s3 + $0x30] sm:$0xff] (!%p296_p3)  ;;  %v1409_v26 = vpack.c.bf16 (!%p296_p3), %v1071_v25, %v1070_v24  ;;  %v1327_v31 = vld [vmem:[%s1623_s4] ss:$0 sm:$0xff] (!%p296_p3) }
   0xa   : > { %v1072_v27 = vld [vmem:[%s1624_s5 + $0x10] sm:$0xff] (!%p296_p3) }
   0xe   : > { %s1631_s21 = smov (!%p358_p4, %s1472_s21), 1 }
   0xf   : > { %s1334_s7 = sshll.u32 %s1631_s21, 4 }
  0x10   : > { %s365_s10 = scalar_lea.vmem %s1619_s0, %s1334_s7  ;;  %s407_s29 = scalar_lea.vmem %s1625_s6, %s1334_s7 }
  0x11   : > { %v1558_v5 = vld [vmem:[%s365_s10] sm:$0xff]  ;;  %v1560_v6 = vld [vmem:[%s365_s10 + $0x8] sm:$0xff] }
  0x12   : > { %431 = vst.msk [vmem:[#allocation2 + $0x8] sm:$0xff] %vm430_vm0, %v1558_v5  ;;  %432 = vst.msk [vmem:[#allocation2 + $0x10] sm:$0xff] %vm430_vm0, %v1560_v6 }
  0x19   : > { %v458_v7 = vld [vmem:[#allocation2 + $0x6] sm:$0xff]  ;;  %v459_v9 = vld [vmem:[#allocation2 + $0xe] sm:$0xff] }
  0x1a   : > { %v711_v8 = vld [vmem:[#allocation2 + $0x8] sm:$0xff]  ;;  %1367 = vmatprep.mubr.msk.f32.mxu1 %vm430_vm0, %v458_v7  ;;  %v712_v10 = vld [vmem:[#allocation2 + $0x10] sm:$0xff] }
  0x1b   : > { %1382 = vmatprep.mubr.msk.f32.mxu0 %vm430_vm0, %v711_v8  ;;  %v455_v11 = vld [vmem:[#allocation2 + $0x5] sm:$0xff]  ;;  %1368 = vmatmul.mubr.msk.f32.vlgmr.msra.gmra.mrb[0].mxu1 %vm430_vm0, %v459_v9  ;;  %v456_v15 = vld [vmem:[#allocation2 + $0xd] sm:$0xff] }
  0x1c   : > { %v798_v12 = vld [vmem:[#allocation2 + $0x9] sm:$0xff]  ;;  %1383 = vmatmul.mubr.msk.f32.vlgmr.msra.gmra.mrb[0].mxu0 %vm430_vm0, %v712_v10  ;;  %1371 = vmatpush3.msra.mxu1 %v457_v4  ;;  %v799_v16 = vld [vmem:[#allocation2 + $0x11] sm:$0xff] }
  0x1d   : > { %1386 = vmatpush3.msra.mxu0 %v1318_v2  ;;  %1372 = vmatprep.mubr.msk.f32.mxu1 %vm430_vm0, %v455_v11  ;;  %v624_v17 = vld [vmem:[#allocation2 + $0x7] sm:$0xff]  ;;  %v625_v20 = vld [vmem:[#allocation2 + $0xf] sm:$0xff] }
  0x1e   : > { %1387 = vmatprep.mubr.msk.f32.mxu0 %vm430_vm0, %v798_v12  ;;  %1390 = vmatprep.subr.mxu0 %v1321_v13  ;;  %v885_v18 = vld [vmem:[#allocation2 + $0xa] sm:$0xff]  ;;  %v886_v21 = vld [vmem:[#allocation2 + $0x12] sm:$0xff] }
  0x1f   : > { %1375 = vmatprep.subr.mxu1 %v1312_v14  ;;  %v972_v22 = vld [vmem:[#allocation2 + $0xb] sm:$0xff]  ;;  %v973_v23 = vld [vmem:[#allocation2 + $0x13] sm:$0xff] }
  0x23   : > { %1373 = vmatmul.mubr.msk.f32.vlgmr.msra.gmra.mrb[0].mxu1 %vm430_vm0, %v456_v15 }
  0x24   : > { %1388 = vmatmul.mubr.msk.f32.vlgmr.msra.gmra.mrb[0].mxu0 %vm430_vm0, %v799_v16  ;;  %1376 = vmatpush3.msra.mxu1 %v1312_v14 }
  0x25   : > { %1391 = vmatpush3.msra.mxu0 %v1321_v13  ;;  %1377 = vmatprep.mubr.msk.f32.mxu1 %vm430_vm0, %v624_v17 }
  0x26   : > { %1392 = vmatprep.mubr.msk.f32.mxu0 %vm430_vm0, %v885_v18  ;;  %1395 = vmatprep.subr.mxu0 %v1324_v19 }
  0x27   : > { %1410 = vmatprep.subr.bf16.mxu1 %v1409_v26 }
  0x2b   : > { %1378 = vmatmul.mubr.msk.f32.vlgmr.msra.gmra.mrb[0].mxu1 %vm430_vm0, %v625_v20 }
  0x2c   : > { %1393 = vmatmul.mubr.msk.f32.vlgmr.msra.gmra.mrb[0].mxu0 %vm430_vm0, %v886_v21  ;;  %1412 = vmatpush3.bf16.msra.mxu1 %v1409_v26 }
  0x2d   : > { %1396 = vmatpush3.msra.mxu0 %v1324_v19  ;;  %1397 = vmatprep.mubr.msk.f32.mxu0 %vm430_vm0, %v972_v22 }
  0x2e   : > { %1404 = vmatprep.subr.mxu1 %v1072_v27 }
  0x30   : > { %1405 = vmatpush3.msra.mxu1 %v1072_v27 }
  0x34   : > { %1398 = vmatmul.mubr.msk.f32.vlgmr.msra.gmra.mrb[0].mxu0 %vm430_vm0, %v973_v23 }
  0xfe   : > { %v1379_v28 = vpop.f32.mrb[0].mxu1 }
  0xff   : > { %v700_v29 = vpop.f32.mrb[1].mxu1 }
 0x107   : > { %v1399_v30 = vpop.f32.mrb[0].mxu0 }
 0x108   : > { %v1413_v32 = vadd.f32 %v1399_v30, %v1379_v28  ;;  %v1048_v33 = vpop.f32.mrb[1].mxu0 }
 0x109   : > { %v1414_v34 = vadd.f32 %v1048_v33, %v700_v29 }
 0x10a   : > { %v1067_v35 = vadd.f32 %v1413_v32, %v1327_v31 }
 0x10b   : > { %v1066_v36 = vadd.f32 %v1414_v34, %v1327_v31 }
 0x10c   : > { %v1069_v38 = vmax.f32 %v1067_v35, 0.0 }
 0x10d   : > { %v1068_v37 = vmax.f32 %v1066_v36, 0.0 }
 0x10f   : > { %1406 = vmatprep.mubr.msk.f32.mxu1 %vm1073_vm1, %v1068_v37 }
 0x110   : > { %1407 = vmatmul.mubr.msk.f32.vlgmr.msra.gmra.mrb[2].mxu1 %vm1073_vm1, %v1069_v38 }
 0x1e3   : > { %v1408_v39 = vpop.f32.mrb[2].mxu1 }
 0x1e4   : > { %v1331_v40 = vmul.f32 -1.442695, %v1408_v39  ;;  %v1146_v41 = vpop.f32.mrb[3].mxu1 }
 0x1e5   : > { %v1330_v42 = vmul.f32 -1.442695, %v1146_v41 }
 0x1e6   : > { %1450 = vpow2.f32 %v1331_v40 }
 0x1e7   : > { %1452 = vpow2.f32 %v1330_v42 }
 0x1f0   : > { %v1451_v43 = vpop.eup %1450 }
 0x1f1   : > { %v1453_v44 = vpop.eup %1452  ;;  %v1162_v45 = vadd.f32 1.0, %v1451_v43 }
 0x1f2   : > { %v1161_v46 = vadd.f32 1.0, %v1453_v44 }
 0x1f3   : > { %1454 = vrcp.f32 %v1162_v45 }
 0x1f4   : > { %1456 = vrcp.f32 %v1161_v46 }
 0x1fd   : > { %v1455_v47 = vpop.eup %1454 }
 0x1fe   : > { %v1457_v48 = vpop.eup %1456  ;;  %v1168_v49 = vmul.f32 %v1455_v47, %v1560_v6 }
 0x1ff   : > { %v1167_v50 = vmul.f32 %v1457_v48, %v1558_v5 }
 0x200   : > { %1170 = vst.msk [vmem:[%s407_s29 + $0x8] sm:$0xff] %vm430_vm0, %v1168_v49 }
 0x201   : > { %1169 = vst.msk [vmem:[%s407_s29] sm:$0xff] %vm430_vm0, %v1167_v50 }
 0x202 PF: > { %s16_s1 = sadd.s32 1, %s1480_s1   ;;  %s1626_s21 = smov %s1476_s22 }
 0x203   : > { %p13_p5 = scmp.ge.s32.totalorder %s16_s1, 4   ;;  %s1627_s22 = smov %s1629_s2 }
 0x205   :  { %15 = sbr.rel (!%p13_p5) target bundleno = 2 (0x2), region = 86 }

</bundles_post_ra>
